<compile_context>
chip_gen: v7x
topology: tpu7x:2x2x1
jax: 0.10.0
libtpu: 0.0.40
codegen_flags: <defaults>
</compile_context>

<pallas_src>
import functools

import jax
import jax.numpy as jnp
from jax.experimental import pallas as pl
from jax.experimental.pallas import tpu as pltpu


# ----------------------------------------------------------------------------
# Model-size constants (stand-in backbone feature sizes)
# ----------------------------------------------------------------------------
N_VERTS = 32              # vertices per decoded mesh (stand-in for DensTMNet output)
N_FACES = 16
FEAT_IMG = 3 * 16 * 16    # flattened NCHW image / patch features (= 768)
N_SIZE = 40               # size_cls one-hot width
N_G = 32                  # relational g_features width
N_CLS_PAD = 16            # cls_codes width padded 9 -> 16 (zero weight rows beyond 9)
HEAD_DIM = 128            # per-head output width (lane-dense)


# ----------------------------------------------------------------------------
# Fused heads kernel: layout head + object head + mesh head in one launch
# ----------------------------------------------------------------------------

def _fused_heads_kernel(img_ref, patch_ref, size_ref, g_ref, cls_ref,
                        wl_ref, bl_ref, wp_ref, ws_ref, wg_ref, wc_ref,
                        bo_ref, bm_ref,
                        lo_ref, obj_ref, mesh_ref, *, n_verts):
    f32 = jnp.float32
    bf16 = jnp.bfloat16

    # ---- layout head: (8,768) @ (768,128) ----
    lo_ref[...] = (jnp.dot(img_ref[...].astype(bf16), wl_ref[...],
                           preferred_element_type=f32) + bl_ref[...])

    # ---- shared patch features: one 256-wide MXU pass for obj + mesh heads ----
    y = jnp.dot(patch_ref[...].astype(bf16), wp_ref[...],
                preferred_element_type=f32)                       # (rows, 256)

    # object head = patch part + size_cls part + g_features part + bias
    obj = (y[:, :HEAD_DIM]
           + jnp.dot(size_ref[...].astype(bf16), ws_ref[...],
                     preferred_element_type=f32)
           + jnp.dot(g_ref[...].astype(bf16), wg_ref[...],
                     preferred_element_type=f32)
           + bo_ref[...])
    obj_ref[...] = obj

    # mesh head = patch part + cls_codes part + bias, with z-coordinate negation
    mesh = (y[:, HEAD_DIM:]
            + jnp.dot(cls_ref[...].astype(bf16), wc_ref[...],
                      preferred_element_type=f32)
            + bm_ref[...])
    # mesh_output[:, 2, :] *= -1  -> columns [2V, 3V) of the flattened (rows, 3V)
    # layout; bound above by 3V so lane padding (cols 96:128) is left untouched.
    col = jax.lax.broadcasted_iota(jnp.int32, mesh.shape, 1)
    sign = jnp.where((col >= 2 * n_verts) & (col < 3 * n_verts),
                     -1.0, 1.0).astype(f32)
    mesh_ref[...] = mesh * sign


def _fused_heads(img, patch, size_cls, g_features, cls_codes, params):
    rows_img = img.shape[0]
    rows_obj = patch.shape[0]

    def full(shape):
        return pl.BlockSpec(tuple(shape), lambda i, _s=len(shape): (0,) * _s)

    kernel = functools.partial(_fused_heads_kernel, n_verts=N_VERTS)
    return pl.pallas_call(
        kernel,
        out_shape=(
            jax.ShapeDtypeStruct((rows_img, HEAD_DIM), jnp.float32),   # layout head
            jax.ShapeDtypeStruct((rows_obj, HEAD_DIM), jnp.float32),   # object head
            jax.ShapeDtypeStruct((rows_obj, HEAD_DIM), jnp.float32),   # mesh head (padded)
        ),
        grid=(1,),
        in_specs=[
            full(img.shape), full(patch.shape), full(size_cls.shape),
            full(g_features.shape), full(cls_codes.shape),
            full(params["w_layout"].shape), full(params["b_layout"].shape),
            full(params["w_patch"].shape), full(params["w_size"].shape),
            full(params["w_g"].shape), full(params["w_cls"].shape),
            full(params["b_obj"].shape), full(params["b_mesh"].shape),
        ],
        out_specs=(
            full((rows_img, HEAD_DIM)),
            full((rows_obj, HEAD_DIM)),
            full((rows_obj, HEAD_DIM)),
        ),
        compiler_params=pltpu.CompilerParams(
            dimension_semantics=("arbitrary",)),
    )(img, patch, size_cls, g_features, cls_codes,
      params["w_layout"], params["b_layout"], params["w_patch"],
      params["w_size"], params["w_g"], params["w_cls"],
      params["b_obj"], params["b_mesh"])


# ----------------------------------------------------------------------------
# Parameters (bf16 weights, f32 biases)
# ----------------------------------------------------------------------------

def init_params(key):
    ks = jax.random.split(key, 8)
    s = 0.02

    def w(k, shape):
        return (jax.random.normal(k, shape, jnp.float32) * s).astype(jnp.bfloat16)

    def b(k, shape):
        return jax.random.normal(k, shape, jnp.float32) * s

    # cls_codes is logically 9-wide; pad weight rows 9:16 with zeros so the
    # lane-padded activation contributes nothing.
    w_cls = w(ks[5], (N_CLS_PAD, HEAD_DIM))
    w_cls = w_cls.at[9:, :].set(0)

    return {
        "w_layout": w(ks[0], (FEAT_IMG, HEAD_DIM)),
        "b_layout": b(ks[1], (1, HEAD_DIM)),
        # cols 0:128 -> object head patch part, cols 128:256 -> mesh head patch part
        "w_patch": w(ks[2], (FEAT_IMG, 2 * HEAD_DIM)),
        "w_size": w(ks[3], (N_SIZE, HEAD_DIM)),
        "w_g": w(ks[4], (N_G, HEAD_DIM)),
        "w_cls": w_cls,
        "b_obj": b(ks[6], (1, HEAD_DIM)),
        "b_mesh": b(ks[7], (1, HEAD_DIM)),
    }


# ----------------------------------------------------------------------------
# Small math helpers (plain JAX)
# ----------------------------------------------------------------------------

def _rot_y(a):
    c, s = jnp.cos(a), jnp.sin(a)
    z, o = jnp.zeros_like(c), jnp.ones_like(c)
    return jnp.stack([jnp.stack([c, z, s]),
                      jnp.stack([z, o, z]),
                      jnp.stack([-s, z, c])])


# ----------------------------------------------------------------------------
# SceneModel forward (Pallas version)
# ----------------------------------------------------------------------------

def scene_forward(params, data):
    """Mirrors SceneModel.forward; returns the same 9-tuple structure."""
    image = data["image"]            # (1, 3, 16, 16)  NCHW
    patch = data["patch"]            # (K, 3, 16, 16)  NCHW
    size_cls = data["size_cls"]      # (K, 40)
    g_features = data["g_features"]  # (K, 32)
    cls_codes = data["cls_codes"]    # (K, 9)
    bdb2d_pos = data["bdb2D_pos"]    # (K, 4)
    cam_k = data["K"]                # (1, 3, 3)

    n_obj = patch.shape[0]
    rows_obj = ((n_obj + 7) // 8) * 8          # sublane-pad object rows to x8
    rows_img = 8                               # sublane-pad the single image row

    # ---- prepare full-(8,128)-tile activations (tiny pads, fused by XLA) ----
    img_flat = jnp.pad(image.reshape(1, -1), ((0, rows_img - 1), (0, 0)))
    patch_flat = patch.reshape(n_obj, -1)
    patch_p = jnp.pad(patch_flat, ((0, rows_obj - n_obj), (0, 0)))
    size_p = jnp.pad(size_cls, ((0, rows_obj - n_obj), (0, 0)))
    g_p = jnp.pad(g_features, ((0, rows_obj - n_obj), (0, 0)))
    cls_p = jnp.pad(cls_codes, ((0, rows_obj - n_obj),
                                (0, N_CLS_PAD - cls_codes.shape[1])))

    # ---- single fused Pallas launch: layout + object + mesh heads ----
    # TODO(synk): LayoutNet / Bdb3DNet / DensTMNet backbones not provided;
    #             stand-in FC heads implement the head-split semantics only.
    lo_full, obj_full, mesh_full = _fused_heads(
        img_flat, patch_p, size_p, g_p, cls_p, params)

    lo_out = lo_full[0:1]
    obj_out = obj_full[:n_obj]
    mesh_flat = mesh_full[:n_obj, :3 * N_VERTS]       # drop 32 lanes of padding

    # ---- layout_estimation outputs ----
    pitch_reg_result = lo_out[:, 0:2]
    roll_reg_result = lo_out[:, 2:4]
    pitch_cls_result = lo_out[:, 4:6]
    roll_cls_result = lo_out[:, 6:8]
    lo_ori_reg_result = lo_out[:, 8:11]
    lo_ori_cls_result = lo_out[:, 11:14]
    lo_centroid_result = lo_out[:, 14:17]
    lo_coeffs_result = lo_out[:, 17:20]

    # ---- object_detection outputs ----
    size_reg_result = obj_out[:, 0:3]
    ori_reg_result = obj_out[:, 3:9]
    ori_cls_result = obj_out[:, 9:15]
    centroid_reg_result = obj_out[:, 15:21]
    centroid_cls_result = obj_out[:, 21:27]
    offset_2d_result = obj_out[:, 27:29]

    # ---- mesh_reconstruction outputs (z already negated in-kernel) ----
    meshes = mesh_flat.reshape(n_obj, 3, N_VERTS)
    mesh_verts = jnp.transpose(meshes, (0, 2, 1))                 # (K, V, 3)
    base = (jnp.arange(N_FACES, dtype=jnp.int32)[:, None]
            + jnp.arange(1, 4, dtype=jnp.int32)[None, :])
    mesh_faces = jnp.broadcast_to(base, (n_obj, N_FACES, 3))      # 1-based faces

    # ---- cam_R_out stand-in (get_rotation_matix_result undefined) ----
    # TODO(synk): bin-based pitch/roll recovery not provided; simple Rx @ Rz.
    pitch = pitch_reg_result[0, jnp.argmax(pitch_cls_result[0])]
    roll = roll_reg_result[0, jnp.argmax(roll_cls_result[0])]
    cp, sp = jnp.cos(pitch), jnp.sin(pitch)
    cr, sr = jnp.cos(roll), jnp.sin(roll)
    one = jnp.float32(1.0)
    zero = jnp.float32(0.0)
    r_x = jnp.stack([jnp.stack([one, zero, zero]),
                     jnp.stack([zero, cp, -sp]),
                     jnp.stack([zero, sp, cp])])
    r_z = jnp.stack([jnp.stack([cr, -sr, zero]),
                     jnp.stack([sr, cr, zero]),
                     jnp.stack([zero, zero, one])])
    cam_r_out = (r_x @ r_z)[None]                                 # (1, 3, 3)

    # ---- lo_bdb3D_out stand-in (get_layout_bdb_sunrgbd undefined) ----
    signs = jnp.array(
        [[sx, sy, sz] for sx in (-1., 1.) for sy in (-1., 1.) for sz in (-1., 1.)],
        jnp.float32)                                              # (8, 3)
    lo_angle = lo_ori_reg_result[0, jnp.argmax(lo_ori_cls_result[0])]
    lo_basis = _rot_y(lo_angle)
    lo_corners = (signs * jnp.exp(lo_coeffs_result)) @ lo_basis + lo_centroid_result
    lo_bdb3d_out = lo_corners[None]                               # (1, 8, 3)

    # ---- per-object 3D box params stand-in (get_bdb_evaluation undefined) ----
    cx, cy = cam_k[0, 0, 2], cam_k[0, 1, 2]
    depth = 3.0 + jnp.abs(
        centroid_reg_result[jnp.arange(n_obj), jnp.argmax(centroid_cls_result, 1)])
    ctr_u = (bdb2d_pos[:, 0] + bdb2d_pos[:, 2]) * 0.5
    ctr_v = (bdb2d_pos[:, 1] + bdb2d_pos[:, 3]) * 0.5
    centroid3d = jnp.stack(
        [(ctr_u / cx - 1.0) * depth, (ctr_v / cy - 1.0) * depth, depth], axis=1)
    coeffs3d = jnp.exp(size_reg_result) * 0.3
    ori = ori_reg_result[jnp.arange(n_obj), jnp.argmax(ori_cls_result, 1)]
    basis3d = jax.vmap(_rot_y)(ori)                               # (K, 3, 3)

    # ---- geometry: P_result, 3D corners, projected 2D boxes (vectorized JAX) ----
    # Deliberately NOT a pallas_call: O(100) FLOPs, a kernel launch would cost
    # orders of magnitude more than letting XLA fuse it.
    x0, y0 = bdb2d_pos[:, 0], bdb2d_pos[:, 1]
    x1, y1 = bdb2d_pos[:, 2], bdb2d_pos[:, 3]
    p_result = jnp.stack(
        [(x0 + x1) * 0.5 - (x1 - x0) * offset_2d_result[:, 0],
         (y0 + y1) * 0.5 - (y1 - y0) * offset_2d_result[:, 1]], axis=1)
    del p_result  # consumed by get_bdb_evaluation in the original pipeline

    local = signs[None, :, :] * coeffs3d[:, None, :]              # (K, 8, 3)
    bdb3d_out = (jnp.einsum('kij,kjl->kil', local, basis3d)
                 + centroid3d[:, None, :])                        # (K, 8, 3)

    cc = jnp.einsum('kij,jl->kil', bdb3d_out, cam_r_out[0])       # camera coords
    z = cc[..., 2]
    z_safe = jnp.where(z >= 0, jnp.maximum(z, 1e-6), jnp.minimum(z, -1e-6))
    u = cc[..., 0] / z_safe
    v = cc[..., 1] / z_safe
    box = jnp.stack([u.min(axis=1), v.min(axis=1),
                     u.max(axis=1), v.max(axis=1)], axis=1)       # (K, 4)
    kscale = jnp.stack([cx, cy, cx, cy])                          # K[0,{0,1},2] scaling
    bdb2d_result = box * kscale

    bdb3d_out_form = {"basis": basis3d, "coeffs": coeffs3d, "centroid": centroid3d}
    # Host copy taken only after every device op above has been dispatched, so it
    # does not block async dispatch of any kernel.
    bdb3d_out_form_cpu = jax.tree.map(jax.device_get, bdb3d_out_form)

    return (lo_bdb3d_out, bdb3d_out_form, bdb3d_out_form_cpu, bdb3d_out,
            bdb2d_result, bdb2d_pos, cam_r_out, mesh_verts, mesh_faces)


# ----------------------------------------------------------------------------
# Main
# ----------------------------------------------------------------------------

if __name__ == "__main__":
    key = jax.random.PRNGKey(0)
    k_param, k_img, k_patch, k_g = jax.random.split(key, 4)

    n_obj = 4
    params = init_params(k_param)

    # TODO(synk): load_data reads images/detections from disk; synthetic data here.
    image = jax.random.normal(k_img, (1, 3, 16, 16), jnp.float32)
    patch = jax.random.normal(k_patch, (n_obj, 3, 16, 16), jnp.float32)
    size_cls = jnp.zeros((n_obj, 40), jnp.float32).at[
        jnp.arange(n_obj), jnp.array([5, 12, 20, 33])].set(1.0)
    cls_codes = jnp.zeros((n_obj, 9), jnp.float32).at[
        jnp.arange(n_obj), jnp.array([1, 3, 5, 7])].set(1.0)
    g_features = jax.random.normal(k_g, (n_obj, 32), jnp.float32)
    bdb2d_pos = jnp.array([[2., 3., 9., 11.],
                           [1., 1., 7., 8.],
                           [5., 4., 14., 13.],
                           [3., 6., 12., 15.]], jnp.float32)
    cam_k = jnp.array([[[20.0, 0.0, 8.0],
                        [0.0, 20.0, 8.0],
                        [0.0, 0.0, 1.0]]], jnp.float32)

    data = {"image": image, "patch": patch, "size_cls": size_cls,
            "cls_codes": cls_codes, "g_features": g_features,
            "bdb2D_pos": bdb2d_pos, "K": cam_k}

    out = scene_forward(params, data)
    (lo_bdb3d_out, bdb3d_out_form, bdb3d_out_form_cpu, bdb3d_out,
     bdb2d_result, bdb2d_input, cam_r_out, mesh_verts, mesh_faces) = out

    jax.block_until_ready((lo_bdb3d_out, bdb3d_out, bdb2d_result, cam_r_out,
                           mesh_verts, mesh_faces))

    assert lo_bdb3d_out.shape == (1, 8, 3)
    assert bdb3d_out.shape == (n_obj, 8, 3)
    assert bdb2d_result.shape == (n_obj, 4)
    assert cam_r_out.shape == (1, 3, 3)
    assert mesh_verts.shape == (n_obj, N_VERTS, 3)
    assert mesh_faces.shape == (n_obj, N_FACES, 3)
    assert bool(jnp.all(jnp.isfinite(bdb2d_result)))
    print("KERNEL_OK")
</pallas_src>

<mosaic_0001>
module attributes {stable_mosaic.version = 11 : i64} {
  func.func @_fused_heads_kernel(%arg0: i32, %arg1: memref<8x768xf32, #tpu.memory_space<vmem>>, %arg2: memref<8x768xf32, #tpu.memory_space<vmem>>, %arg3: memref<8x40xf32, #tpu.memory_space<vmem>>, %arg4: memref<8x32xf32, #tpu.memory_space<vmem>>, %arg5: memref<8x16xf32, #tpu.memory_space<vmem>>, %arg6: memref<768x128xbf16, #tpu.memory_space<vmem>>, %arg7: memref<1x128xf32, #tpu.memory_space<vmem>>, %arg8: memref<768x256xbf16, #tpu.memory_space<vmem>>, %arg9: memref<40x128xbf16, #tpu.memory_space<vmem>>, %arg10: memref<32x128xbf16, #tpu.memory_space<vmem>>, %arg11: memref<16x128xbf16, #tpu.memory_space<vmem>>, %arg12: memref<1x128xf32, #tpu.memory_space<vmem>>, %arg13: memref<1x128xf32, #tpu.memory_space<vmem>>, %arg14: memref<8x128xf32, #tpu.memory_space<vmem>>, %arg15: memref<8x128xf32, #tpu.memory_space<vmem>>, %arg16: memref<8x128xf32, #tpu.memory_space<vmem>>) attributes {dimension_semantics = [#tpu.dimension_semantics<arbitrary>], iteration_bounds = array<i64: 1>, scalar_prefetch = 0 : i64, scratch_operands = 0 : i64, tpu.core_type = #tpu.core_type<tc>, window_params = [{pipeline_mode = #tpu.pipeline_mode<synchronous>, transform_indices = @transform_0, window_bounds = array<i64: 8, 768>}, {pipeline_mode = #tpu.pipeline_mode<synchronous>, transform_indices = @transform_1, window_bounds = array<i64: 8, 768>}, {pipeline_mode = #tpu.pipeline_mode<synchronous>, transform_indices = @transform_2, window_bounds = array<i64: 8, 40>}, {pipeline_mode = #tpu.pipeline_mode<synchronous>, transform_indices = @transform_3, window_bounds = array<i64: 8, 32>}, {pipeline_mode = #tpu.pipeline_mode<synchronous>, transform_indices = @transform_4, window_bounds = array<i64: 8, 16>}, {pipeline_mode = #tpu.pipeline_mode<synchronous>, transform_indices = @transform_5, window_bounds = array<i64: 768, 128>}, {pipeline_mode = #tpu.pipeline_mode<synchronous>, transform_indices = @transform_6, window_bounds = array<i64: 1, 128>}, {pipeline_mode = #tpu.pipeline_mode<synchronous>, transform_indices = @transform_7, window_bounds = array<i64: 768, 256>}, {pipeline_mode = #tpu.pipeline_mode<synchronous>, transform_indices = @transform_8, window_bounds = array<i64: 40, 128>}, {pipeline_mode = #tpu.pipeline_mode<synchronous>, transform_indices = @transform_9, window_bounds = array<i64: 32, 128>}, {pipeline_mode = #tpu.pipeline_mode<synchronous>, transform_indices = @transform_10, window_bounds = array<i64: 16, 128>}, {pipeline_mode = #tpu.pipeline_mode<synchronous>, transform_indices = @transform_11, window_bounds = array<i64: 1, 128>}, {pipeline_mode = #tpu.pipeline_mode<synchronous>, transform_indices = @transform_12, window_bounds = array<i64: 1, 128>}, {pipeline_mode = #tpu.pipeline_mode<synchronous>, transform_indices = @transform_13, window_bounds = array<i64: 8, 128>}, {pipeline_mode = #tpu.pipeline_mode<synchronous>, transform_indices = @transform_14, window_bounds = array<i64: 8, 128>}, {pipeline_mode = #tpu.pipeline_mode<synchronous>, transform_indices = @transform_15, window_bounds = array<i64: 8, 128>}]} {
    %c0 = arith.constant 0 : index
    %c0_0 = arith.constant 0 : index
    %0 = vector.load %arg1[%c0, %c0_0] : memref<8x768xf32, #tpu.memory_space<vmem>>, vector<8x768xf32>
    %1 = arith.truncf %0 : vector<8x768xf32> to vector<8x768xbf16>
    %c0_1 = arith.constant 0 : index
    %c0_2 = arith.constant 0 : index
    %2 = vector.load %arg6[%c0_1, %c0_2] : memref<768x128xbf16, #tpu.memory_space<vmem>>, vector<768x128xbf16>
    %cst = arith.constant dense<0.000000e+00> : vector<8x128xf32>
    %3 = tpu.matmul %1, %2, %cst {dimension_numbers = #tpu.dot_dimension_numbers<[1], [0], [0], [1], [0, 0, 1, 1], [], []>} : vector<8x768xbf16>, vector<768x128xbf16>, vector<8x128xf32> -> vector<8x128xf32>
    %c0_3 = arith.constant 0 : index
    %c0_4 = arith.constant 0 : index
    %4 = vector.load %arg7[%c0_3, %c0_4] : memref<1x128xf32, #tpu.memory_space<vmem>>, vector<1x128xf32>
    %5 = vector.broadcast %4 : vector<1x128xf32> to vector<8x128xf32>
    %6 = arith.addf %3, %5 : vector<8x128xf32>
    %c0_5 = arith.constant 0 : index
    %c0_6 = arith.constant 0 : index
    %7 = vector.load %arg14[%c0_5, %c0_6] : memref<8x128xf32, #tpu.memory_space<vmem>>, vector<8x128xf32>
    tpu.vector_store %arg14[%c0_5, %c0_6], %6 {strides = array<i32>} : memref<8x128xf32, #tpu.memory_space<vmem>>, vector<8x128xf32>,
    %c0_7 = arith.constant 0 : index
    %c0_8 = arith.constant 0 : index
    %8 = vector.load %arg2[%c0_7, %c0_8] : memref<8x768xf32, #tpu.memory_space<vmem>>, vector<8x768xf32>
    %9 = arith.truncf %8 : vector<8x768xf32> to vector<8x768xbf16>
    %c0_9 = arith.constant 0 : index
    %c0_10 = arith.constant 0 : index
    %10 = vector.load %arg8[%c0_9, %c0_10] : memref<768x256xbf16, #tpu.memory_space<vmem>>, vector<768x256xbf16>
    %cst_11 = arith.constant dense<0.000000e+00> : vector<8x256xf32>
    %11 = tpu.matmul %9, %10, %cst_11 {dimension_numbers = #tpu.dot_dimension_numbers<[1], [0], [0], [1], [0, 0, 1, 1], [], []>} : vector<8x768xbf16>, vector<768x256xbf16>, vector<8x256xf32> -> vector<8x256xf32>
    %12 = vector.extract_strided_slice %11 {offsets = [0, 0], sizes = [8, 128], strides = [1, 1]} : vector<8x256xf32> to vector<8x128xf32>
    %c0_12 = arith.constant 0 : index
    %c0_13 = arith.constant 0 : index
    %13 = vector.load %arg3[%c0_12, %c0_13] : memref<8x40xf32, #tpu.memory_space<vmem>>, vector<8x40xf32>
    %14 = arith.truncf %13 : vector<8x40xf32> to vector<8x40xbf16>
    %c0_14 = arith.constant 0 : index
    %c0_15 = arith.constant 0 : index
    %15 = vector.load %arg9[%c0_14, %c0_15] : memref<40x128xbf16, #tpu.memory_space<vmem>>, vector<40x128xbf16>
    %cst_16 = arith.constant dense<0.000000e+00> : vector<8x128xf32>
    %16 = tpu.matmul %14, %15, %cst_16 {dimension_numbers = #tpu.dot_dimension_numbers<[1], [0], [0], [1], [0, 0, 1, 1], [], []>} : vector<8x40xbf16>, vector<40x128xbf16>, vector<8x128xf32> -> vector<8x128xf32>
    %17 = arith.addf %12, %16 : vector<8x128xf32>
    %c0_17 = arith.constant 0 : index
    %c0_18 = arith.constant 0 : index
    %18 = vector.load %arg4[%c0_17, %c0_18] : memref<8x32xf32, #tpu.memory_space<vmem>>, vector<8x32xf32>
    %19 = arith.truncf %18 : vector<8x32xf32> to vector<8x32xbf16>
    %c0_19 = arith.constant 0 : index
    %c0_20 = arith.constant 0 : index
    %20 = vector.load %arg10[%c0_19, %c0_20] : memref<32x128xbf16, #tpu.memory_space<vmem>>, vector<32x128xbf16>
    %cst_21 = arith.constant dense<0.000000e+00> : vector<8x128xf32>
    %21 = tpu.matmul %19, %20, %cst_21 {dimension_numbers = #tpu.dot_dimension_numbers<[1], [0], [0], [1], [0, 0, 1, 1], [], []>} : vector<8x32xbf16>, vector<32x128xbf16>, vector<8x128xf32> -> vector<8x128xf32>
    %22 = arith.addf %17, %21 : vector<8x128xf32>
    %c0_22 = arith.constant 0 : index
    %c0_23 = arith.constant 0 : index
    %23 = vector.load %arg12[%c0_22, %c0_23] : memref<1x128xf32, #tpu.memory_space<vmem>>, vector<1x128xf32>
    %24 = vector.broadcast %23 : vector<1x128xf32> to vector<8x128xf32>
    %25 = arith.addf %22, %24 : vector<8x128xf32>
    %c0_24 = arith.constant 0 : index
    %c0_25 = arith.constant 0 : index
    %26 = vector.load %arg15[%c0_24, %c0_25] : memref<8x128xf32, #tpu.memory_space<vmem>>, vector<8x128xf32>
    tpu.vector_store %arg15[%c0_24, %c0_25], %25 {strides = array<i32>} : memref<8x128xf32, #tpu.memory_space<vmem>>, vector<8x128xf32>,
    %27 = vector.extract_strided_slice %11 {offsets = [0, 128], sizes = [8, 128], strides = [1, 1]} : vector<8x256xf32> to vector<8x128xf32>
    %c0_26 = arith.constant 0 : index
    %c0_27 = arith.constant 0 : index
    %28 = vector.load %arg5[%c0_26, %c0_27] : memref<8x16xf32, #tpu.memory_space<vmem>>, vector<8x16xf32>
    %29 = arith.truncf %28 : vector<8x16xf32> to vector<8x16xbf16>
    %c0_28 = arith.constant 0 : index
    %c0_29 = arith.constant 0 : index
    %30 = vector.load %arg11[%c0_28, %c0_29] : memref<16x128xbf16, #tpu.memory_space<vmem>>, vector<16x128xbf16>
    %cst_30 = arith.constant dense<0.000000e+00> : vector<8x128xf32>
    %31 = tpu.matmul %29, %30, %cst_30 {dimension_numbers = #tpu.dot_dimension_numbers<[1], [0], [0], [1], [0, 0, 1, 1], [], []>} : vector<8x16xbf16>, vector<16x128xbf16>, vector<8x128xf32> -> vector<8x128xf32>
    %32 = arith.addf %27, %31 : vector<8x128xf32>
    %c0_31 = arith.constant 0 : index
    %c0_32 = arith.constant 0 : index
    %33 = vector.load %arg13[%c0_31, %c0_32] : memref<1x128xf32, #tpu.memory_space<vmem>>, vector<1x128xf32>
    %34 = vector.broadcast %33 : vector<1x128xf32> to vector<8x128xf32>
    %35 = arith.addf %32, %34 : vector<8x128xf32>
    %36 = tpu.iota {dimensions = array<i32: 1>} : vector<8x128xi32>
    %c64_i32 = arith.constant 64 : i32
    %37 = vector.broadcast %c64_i32 : i32 to vector<8x128xi32>
    %38 = arith.cmpi sge, %36, %37 : vector<8x128xi32>
    %c96_i32 = arith.constant 96 : i32
    %39 = vector.broadcast %c96_i32 : i32 to vector<8x128xi32>
    %40 = arith.cmpi slt, %36, %39 : vector<8x128xi32>
    %41 = arith.andi %38, %40 : vector<8x128xi1>
    %cst_33 = arith.constant -1.000000e+00 : f32
    %cst_34 = arith.constant 1.000000e+00 : f32
    %42 = vector.broadcast %cst_33 : f32 to vector<8x128xf32>
    %43 = vector.broadcast %cst_34 : f32 to vector<8x128xf32>
    %44 = arith.select %41, %42, %43 : vector<8x128xi1>, vector<8x128xf32>
    %45 = arith.mulf %35, %44 : vector<8x128xf32>
    %c0_35 = arith.constant 0 : index
    %c0_36 = arith.constant 0 : index
    %46 = vector.load %arg16[%c0_35, %c0_36] : memref<8x128xf32, #tpu.memory_space<vmem>>, vector<8x128xf32>
    tpu.vector_store %arg16[%c0_35, %c0_36], %45 {strides = array<i32>} : memref<8x128xf32, #tpu.memory_space<vmem>>, vector<8x128xf32>,
    return
  }
  func.func @transform_0(%arg0: i32) -> (i32, i32) {
    %c0_i32 = arith.constant 0 : i32
    %c0_i32_0 = arith.constant 0 : i32
    %c0_i32_1 = arith.constant 0 : i32
    return %c0_i32, %c0_i32_0 : i32, i32
  }
  func.func @transform_1(%arg0: i32) -> (i32, i32) {
    %c0_i32 = arith.constant 0 : i32
    %c0_i32_0 = arith.constant 0 : i32
    %c0_i32_1 = arith.constant 0 : i32
    return %c0_i32, %c0_i32_0 : i32, i32
  }
  func.func @transform_2(%arg0: i32) -> (i32, i32) {
    %c0_i32 = arith.constant 0 : i32
    %c0_i32_0 = arith.constant 0 : i32
    %c0_i32_1 = arith.constant 0 : i32
    return %c0_i32, %c0_i32_0 : i32, i32
  }
  func.func @transform_3(%arg0: i32) -> (i32, i32) {
    %c0_i32 = arith.constant 0 : i32
    %c0_i32_0 = arith.constant 0 : i32
    %c0_i32_1 = arith.constant 0 : i32
    return %c0_i32, %c0_i32_0 : i32, i32
  }
  func.func @transform_4(%arg0: i32) -> (i32, i32) {
    %c0_i32 = arith.constant 0 : i32
    %c0_i32_0 = arith.constant 0 : i32
    %c0_i32_1 = arith.constant 0 : i32
    return %c0_i32, %c0_i32_0 : i32, i32
  }
  func.func @transform_5(%arg0: i32) -> (i32, i32) {
    %c0_i32 = arith.constant 0 : i32
    %c0_i32_0 = arith.constant 0 : i32
    %c0_i32_1 = arith.constant 0 : i32
    return %c0_i32, %c0_i32_0 : i32, i32
  }
  func.func @transform_6(%arg0: i32) -> (i32, i32) {
    %c0_i32 = arith.constant 0 : i32
    %c0_i32_0 = arith.constant 0 : i32
    %c0_i32_1 = arith.constant 0 : i32
    return %c0_i32, %c0_i32_0 : i32, i32
  }
  func.func @transform_7(%arg0: i32) -> (i32, i32) {
    %c0_i32 = arith.constant 0 : i32
    %c0_i32_0 = arith.constant 0 : i32
    %c0_i32_1 = arith.constant 0 : i32
    return %c0_i32, %c0_i32_0 : i32, i32
  }
  func.func @transform_8(%arg0: i32) -> (i32, i32) {
    %c0_i32 = arith.constant 0 : i32
    %c0_i32_0 = arith.constant 0 : i32
    %c0_i32_1 = arith.constant 0 : i32
    return %c0_i32, %c0_i32_0 : i32, i32
  }
  func.func @transform_9(%arg0: i32) -> (i32, i32) {
    %c0_i32 = arith.constant 0 : i32
    %c0_i32_0 = arith.constant 0 : i32
    %c0_i32_1 = arith.constant 0 : i32
    return %c0_i32, %c0_i32_0 : i32, i32
  }
  func.func @transform_10(%arg0: i32) -> (i32, i32) {
    %c0_i32 = arith.constant 0 : i32
    %c0_i32_0 = arith.constant 0 : i32
    %c0_i32_1 = arith.constant 0 : i32
    return %c0_i32, %c0_i32_0 : i32, i32
  }
  func.func @transform_11(%arg0: i32) -> (i32, i32) {
    %c0_i32 = arith.constant 0 : i32
    %c0_i32_0 = arith.constant 0 : i32
    %c0_i32_1 = arith.constant 0 : i32
    return %c0_i32, %c0_i32_0 : i32, i32
  }
  func.func @transform_12(%arg0: i32) -> (i32, i32) {
    %c0_i32 = arith.constant 0 : i32
    %c0_i32_0 = arith.constant 0 : i32
    %c0_i32_1 = arith.constant 0 : i32
    return %c0_i32, %c0_i32_0 : i32, i32
  }
  func.func @transform_13(%arg0: i32) -> (i32, i32) {
    %c0_i32 = arith.constant 0 : i32
    %c0_i32_0 = arith.constant 0 : i32
    %c0_i32_1 = arith.constant 0 : i32
    return %c0_i32, %c0_i32_0 : i32, i32
  }
  func.func @transform_14(%arg0: i32) -> (i32, i32) {
    %c0_i32 = arith.constant 0 : i32
    %c0_i32_0 = arith.constant 0 : i32
    %c0_i32_1 = arith.constant 0 : i32
    return %c0_i32, %c0_i32_0 : i32, i32
  }
  func.func @transform_15(%arg0: i32) -> (i32, i32) {
    %c0_i32 = arith.constant 0 : i32
    %c0_i32_0 = arith.constant 0 : i32
    %c0_i32_1 = arith.constant 0 : i32
    return %c0_i32, %c0_i32_0 : i32, i32
  }
}

</mosaic_0001>

<bundles_post_ra>
// kernel: tpu_custom_call.1
= control target key start
LH: loop header
LB: loop body
LE: loop exit
PB: predicated region body
PF: predicated region fallthrough
CT: control target
= control target key end

     0   :  { %21 = vsyncpa [#allocation3], 0  ;;  %s2577_s0 = inlined_call_operand.hbm [shape: f32[8,768], index: 0, kind: input, shape index: {}]   ;;  %s2578_s1 = inlined_call_operand.hbm [shape: f32[8,768], index: 1, kind: input, shape index: {}]   ;;  %s2579_s2 = inlined_call_operand.hbm [shape: f32[8,40], index: 2, kind: input, shape index: {}]   ;;  %s2580_s3 = inlined_call_operand.vmem [shape: f32[8,32], index: 3, kind: input, shape index: {}]   ;;  %s2581_s4 = inlined_call_operand.hbm [shape: f32[8,16], index: 4, kind: input, shape index: {}]   ;;  %s2582_s5 = inlined_call_operand.hbm [shape: bf16[768,128], index: 5, kind: input, shape index: {}]   ;;  %s2583_s6 = inlined_call_operand.vmem [shape: f32[1,128], index: 6, kind: input, shape index: {}]   ;;  %s2584_s7 = inlined_call_operand.hbm [shape: bf16[768,256], index: 7, kind: input, shape index: {}]   ;;  %s2585_s8 = inlined_call_operand.vmem [shape: bf16[40,128], index: 8, kind: input, shape index: {}]   ;;  %s2586_s9 = inlined_call_operand.hbm [shape: bf16[32,128], index: 9, kind: input, shape index: {}]   ;;  %s2587_s10 = inlined_call_operand.vmem [shape: bf16[16,128], index: 10, kind: input, shape index: {}]   ;;  %s2588_s11 = inlined_call_operand.vmem [shape: f32[1,128], index: 11, kind: input, shape index: {}]   ;;  %s2589_s12 = inlined_call_operand.vmem [shape: f32[1,128], index: 12, kind: input, shape index: {}]   ;;  %s2590_s13 = inlined_call_operand.hbm [shape: f32[8,128], index: 13, kind: output, shape index: {0}]   ;;  %s2591_s14 = inlined_call_operand.hbm [shape: f32[8,128], index: 14, kind: output, shape index: {1}]   ;;  %s2592_s15 = inlined_call_operand.hbm [shape: f32[8,128], index: 15, kind: output, shape index: {2}]  }
   0x1   :  { %22 = vsyncpa [#allocation6], 0 }
   0x2   :  { %23 = vsyncpa [#allocation9], 0 }
   0x3   :  { %24 = vsyncpa [#allocation12], 0 }
   0x4   :  { %25 = vsyncpa [#allocation4], 0 }
   0x5   :  { %26 = vsyncpa [#allocation16], 0  ;;  %s2333_s18 = smov [#allocation5]   ;;  %s2334_s20 = smov [#allocation8]  }
   0x6   :  { %s43_s19 = sshll.u32 %s2333_s18, 4  ;;  %s65_s21 = sshll.u32 %s2334_s20, 4  ;;  %s44_s19 = int_to_ptr.vmem [resolvable:$true] %s43_s19  ;;  %s66_s21 = int_to_ptr.vmem [resolvable:$true] %s65_s21 }
   0x7   :  { %s2101_s24 = scalar_lea.hbm %s2578_s1, 768 }
   0x8   :  { %p2102_p0 = scmp.ne.s32.totalorder %s2578_s1, %s2101_s24  ;;  %p2105_p1 = scmp.lt.u32.totalorder %s2101_s24, %s2578_s1 }
   0xa   :  { %p2107_p2 = pnand %p2105_p1, %p2102_p0 }
   0xc   :  { %2110 = shalt.err (!%p2107_p2)
}
   0xd   :  { %s2111_s29 = scalar_lea.vmem %s44_s19, 768  ;;  %p2116_p4 = scmp.lt.s32.totalorder %s44_s19, %s44_s19 }
   0xe   :  { %p2112_p3 = scmp.ne.s32.totalorder %s44_s19, %s2111_s29  ;;  %p2117_p5 = scmp.lt.s32.totalorder %s2111_s29, %s2111_s29 }
  0x10   :  { %p2118_p6 = por %p2117_p5, %p2116_p4 }
  0x12   :  { %p2119_p7 = pnand %p2118_p6, %p2112_p3 }
  0x14   :  { %2122 = shalt.err (!%p2119_p7)
}
  0x15   :  { %46 = dma.hbm_to_vmem [thread:$0]  %s2578_s1, 768, %s44_s19, [#allocation6]  }
  0x16   :  { %s2123_s20 = scalar_lea.hbm %s2581_s4, 128 }
  0x17   :  { %p2124_p8 = scmp.ne.s32.totalorder %s2581_s4, %s2123_s20  ;;  %p2127_p9 = scmp.lt.u32.totalorder %s2123_s20, %s2581_s4 }
  0x19   :  { %p2129_p10 = pnand %p2127_p9, %p2124_p8 }
  0x1b   :  { %2132 = shalt.err (!%p2129_p10)
}
  0x1c   :  { %s2133_s26 = scalar_lea.vmem %s66_s21, 128  ;;  %p2138_p12 = scmp.lt.s32.totalorder %s66_s21, %s66_s21 }
  0x1d   :  { %p2134_p11 = scmp.ne.s32.totalorder %s66_s21, %s2133_s26  ;;  %p2139_p13 = scmp.lt.s32.totalorder %s2133_s26, %s2133_s26 }
  0x1f   :  { %p2140_p0 = por %p2139_p13, %p2138_p12 }
  0x21   :  { %p2141_p1 = pnand %p2140_p0, %p2134_p11 }
  0x23   :  { %2144 = shalt.err (!%p2141_p1)
}
  0x24   :  { %68 = dma.hbm_to_vmem [thread:$0]  %s2581_s4, 128, %s66_s21, [#allocation9]  }
  0x25   :  { %s2335_s27 = smov [#allocation11]   ;;  %s2145_s16 = scalar_lea.hbm %s2584_s7, 12288 }
  0x26   :  { %s88_s28 = sshll.u32 %s2335_s27, 4  ;;  %p2146_p2 = scmp.ne.s32.totalorder %s2584_s7, %s2145_s16  ;;  %s89_s28 = int_to_ptr.vmem [resolvable:$true] %s88_s28 }
  0x27   :  { %p2149_p3 = scmp.lt.u32.totalorder %s2145_s16, %s2584_s7 }
  0x29   :  { %p2151_p4 = pnand %p2149_p3, %p2146_p2 }
  0x2b   :  { %2154 = shalt.err (!%p2151_p4)
}
  0x2c   :  { %s2155_s23 = scalar_lea.vmem %s89_s28, 12288  ;;  %p2160_p6 = scmp.lt.s32.totalorder %s89_s28, %s89_s28 }
  0x2d   :  { %p2156_p5 = scmp.ne.s32.totalorder %s89_s28, %s2155_s23  ;;  %p2161_p7 = scmp.lt.s32.totalorder %s2155_s23, %s2155_s23 }
  0x2f   :  { %p2162_p8 = por %p2161_p7, %p2160_p6 }
  0x31   :  { %p2163_p9 = pnand %p2162_p8, %p2156_p5 }
  0x33   :  { %2166 = shalt.err (!%p2163_p9)
}
  0x34   :  { %s2336_s4 = smov 128   ;;  %s2337_s21 = smov 8  }
  0x35   :  { %94 = dma.hbm_to_vmem [thread:$0]  %s2584_s7, 12288, %s89_s28, [#allocation12], %s2336_s4, %s2336_s4, %s2337_s21  }
  0x36   :  { %s2338_s26 = smov [#allocation2]   ;;  %s2339_s19 = smov [#allocation7]  }
  0x37   :  { %s33_s1 = sshll.u32 %s2338_s26, 4  ;;  %s53_s27 = sshll.u32 %s2339_s19, 4  ;;  %s34_s1 = int_to_ptr.vmem [resolvable:$true] %s33_s1  ;;  %s54_s27 = int_to_ptr.vmem [resolvable:$true] %s53_s27 }
  0x38   :  { %s2167_s16 = scalar_lea.hbm %s2577_s0, 768 }
  0x39   :  { %p2168_p10 = scmp.ne.s32.totalorder %s2577_s0, %s2167_s16  ;;  %p2171_p11 = scmp.lt.u32.totalorder %s2167_s16, %s2577_s0 }
  0x3b   :  { %p2173_p12 = pnand %p2171_p11, %p2168_p10 }
  0x3d   :  { %2176 = shalt.err (!%p2173_p12)
}
  0x3e   :  { %s2177_s7 = scalar_lea.vmem %s34_s1, 768  ;;  %p2182_p0 = scmp.lt.s32.totalorder %s34_s1, %s34_s1 }
  0x3f   :  { %p2178_p13 = scmp.ne.s32.totalorder %s34_s1, %s2177_s7  ;;  %p2183_p1 = scmp.lt.s32.totalorder %s2177_s7, %s2177_s7 }
  0x41   :  { %p2184_p2 = por %p2183_p1, %p2182_p0 }
  0x43   :  { %p2185_p3 = pnand %p2184_p2, %p2178_p13 }
  0x45   :  { %2188 = shalt.err (!%p2185_p3)
}
  0x46   :  { %36 = dma.hbm_to_vmem [thread:$0]  %s2577_s0, 768, %s34_s1, [#allocation3]  }
  0x47   :  { %s2189_s24 = scalar_lea.hbm %s2579_s2, 128 }
  0x48   :  { %p2190_p4 = scmp.ne.s32.totalorder %s2579_s2, %s2189_s24  ;;  %p2193_p5 = scmp.lt.u32.totalorder %s2189_s24, %s2579_s2 }
  0x4a   :  { %p2195_p6 = pnand %p2193_p5, %p2190_p4 }
  0x4c   :  { %2198 = shalt.err (!%p2195_p6)
}
  0x4d   :  { %s2199_s30 = scalar_lea.vmem %s54_s27, 128  ;;  %p2204_p8 = scmp.lt.s32.totalorder %s54_s27, %s54_s27 }
  0x4e   :  { %p2200_p7 = scmp.ne.s32.totalorder %s54_s27, %s2199_s30  ;;  %p2205_p9 = scmp.lt.s32.totalorder %s2199_s30, %s2199_s30 }
  0x50   :  { %p2206_p10 = por %p2205_p9, %p2204_p8 }
  0x52   :  { %p2207_p11 = pnand %p2206_p10, %p2200_p7 }
  0x54   :  { %2210 = shalt.err (!%p2207_p11)
}
  0x55   :  { %56 = dma.hbm_to_vmem [thread:$0]  %s2579_s2, 128, %s54_s27, [#allocation6]  }
  0x56   :  { %s2340_s16 = smov [#allocation10]   ;;  %s2211_s22 = scalar_lea.hbm %s2582_s5, 6144 }
  0x57   :  { %s74_s17 = sshll.u32 %s2340_s16, 4  ;;  %p2212_p12 = scmp.ne.s32.totalorder %s2582_s5, %s2211_s22  ;;  %s75_s17 = int_to_ptr.vmem [resolvable:$true] %s74_s17 }
  0x58   :  { %p2215_p13 = scmp.lt.u32.totalorder %s2211_s22, %s2582_s5 }
  0x5a   :  { %p2217_p0 = pnand %p2215_p13, %p2212_p12 }
  0x5c   :  { %2220 = shalt.err (!%p2217_p0)
}
  0x5d   :  { %s2221_s21 = scalar_lea.vmem %s75_s17, 6144  ;;  %p2226_p2 = scmp.lt.s32.totalorder %s75_s17, %s75_s17 }
  0x5e   :  { %p2222_p1 = scmp.ne.s32.totalorder %s75_s17, %s2221_s21  ;;  %p2227_p3 = scmp.lt.s32.totalorder %s2221_s21, %s2221_s21 }
  0x60   :  { %p2228_p4 = por %p2227_p3, %p2226_p2 }
  0x62   :  { %p2229_p5 = pnand %p2228_p4, %p2222_p1 }
  0x64   :  { %2232 = shalt.err (!%p2229_p5)
}
  0x65   :  { %s2341_s2 = smov 64   ;;  %s2342_s27 = smov 4  }
  0x66   :  { %80 = dma.hbm_to_vmem [thread:$0]  %s2582_s5, 6144, %s75_s17, [#allocation9], %s2341_s2, %s2341_s2, %s2342_s27  }
  0x67   :  { %s2343_s26 = smov [#allocation13]   ;;  %s2233_s0 = scalar_lea.hbm %s2586_s9, 256 }
  0x68   :  { %s102_s19 = sshll.u32 %s2343_s26, 4  ;;  %p2234_p6 = scmp.ne.s32.totalorder %s2586_s9, %s2233_s0  ;;  %s103_s19 = int_to_ptr.vmem [resolvable:$true] %s102_s19 }
  0x69   :  { %p2237_p7 = scmp.lt.u32.totalorder %s2233_s0, %s2586_s9 }
  0x6b   :  { %p2239_p8 = pnand %p2237_p7, %p2234_p6 }
  0x6d   :  { %2242 = shalt.err (!%p2239_p8)
}
  0x6e   :  { %s2243_s22 = scalar_lea.vmem %s103_s19, 256  ;;  %p2248_p10 = scmp.lt.s32.totalorder %s103_s19, %s103_s19 }
  0x6f   :  { %p2244_p9 = scmp.ne.s32.totalorder %s103_s19, %s2243_s22  ;;  %p2249_p11 = scmp.lt.s32.totalorder %s2243_s22, %s2243_s22 }
  0x71   :  { %p2250_p12 = por %p2249_p11, %p2248_p10 }
  0x73   :  { %p2251_p13 = pnand %p2250_p12, %p2244_p9 }
  0x75   :  { %2254 = shalt.err (!%p2251_p13)
}
  0x76   :  { %108 = dma.hbm_to_vmem [thread:$0]  %s2586_s9, 256, %s103_s19, [#allocation12], %s2341_s2, %s2341_s2, %s2342_s27  }
  0x77   :  { %2321 = dma.done.wait [#allocation3], 768  }
  0x78   :  { %2322 = vsyncadd [#allocation3], 4294966528 }
  0x79   :  { %2323 = dma.done.wait [#allocation6], 896  }
  0x7a   :  { %2324 = vsyncadd [#allocation6], 4294966400 }
  0x7b   :  { %2325 = dma.done.wait [#allocation9], 6272  }
  0x7c   :  { %2326 = vsyncadd [#allocation9], 4294961024 }
  0x7d   :  { %2327 = dma.done.wait [#allocation12], 12544  }
  0x7e   :  { %2328 = vsyncadd [#allocation12], 4294954752  ;;  %v1903_v0 = vld [vmem:[#allocation10 + $0x40] sm:$0xff]   ;;  %v1907_v4 = vld [vmem:[#allocation10 + $0x48] sm:$0xff]   ;;  %vm1398_vm0 = vcmask 1043456   ;;  %vm2345_vm1 = vmmov 0  }
  0x7f   :  { %v1904_v1 = vld [vmem:[#allocation10 + $0xc0] sm:$0xff]   ;;  %1787 = vmatprep.subr.bf16.mxu0 %v1903_v0  ;;  %v1908_v5 = vld [vmem:[#allocation10 + $0xc8] sm:$0xff]   ;;  %v1911_v8 = vld [vmem:[#allocation10 + $0x50] sm:$0xff]   ;;  %vm1394_vm2 = vcmask 326656   ;;  %vm1461_vm3 = vcmask 261120   ;;  %vm1525_vm4 = vcmask 130048  }
  0x80   :  { %v1905_v2 = vld [vmem:[#allocation10] sm:$0xff]   ;;  %1809 = vmatprep.subr.bf16.mxu1 %v1904_v1  ;;  %v1909_v6 = vld [vmem:[#allocation10 + $0x8] sm:$0xff]   ;;  %v1912_v9 = vld [vmem:[#allocation10 + $0xd0] sm:$0xff]   ;;  %s2346_s25 = smov [#allocation14]  }
  0x81   :  { %v1906_v3 = vld [vmem:[#allocation10 + $0x80] sm:$0xff]   ;;  %1788 = vmatpush3.bf16.msra.mxu0 %v1905_v2  ;;  %v1910_v7 = vld [vmem:[#allocation10 + $0x88] sm:$0xff]   ;;  %v1913_v10 = vld [vmem:[#allocation10 + $0x10] sm:$0xff]   ;;  %s1592_s26 = sshll.u32 %s2346_s25, 4  ;;  %s1593_s26 = int_to_ptr.vmem [resolvable:$true] %s1592_s26 }
  0x82   :  { %1810 = vmatpush3.bf16.msra.mxu1 %v1906_v3  ;;  %1789 = vmatprep.subr.bf16.mxu0 %v1907_v4  ;;  %v1914_v11 = vld [vmem:[#allocation10 + $0x90] sm:$0xff]   ;;  %v1915_v12 = vld [vmem:[#allocation10 + $0x58] sm:$0xff]   ;;  %v1919_v16 = vld [vmem:[#allocation10 + $0x60] sm:$0xff]   ;;  %p2260_p1 = scmp.lt.s32.totalorder %s1593_s26, %s1593_s26 }
  0x83   :  { %1811 = vmatprep.subr.bf16.mxu1 %v1908_v5  ;;  %v1916_v13 = vld [vmem:[#allocation10 + $0xd8] sm:$0xff]   ;;  %v1920_v17 = vld [vmem:[#allocation10 + $0xe0] sm:$0xff]   ;;  %v1923_v20 = vld [vmem:[#allocation10 + $0x68] sm:$0xff]  }
  0x84   :  { %v1917_v14 = vld [vmem:[#allocation10 + $0x18] sm:$0xff]   ;;  %v1921_v18 = vld [vmem:[#allocation10 + $0x20] sm:$0xff]   ;;  %v1924_v21 = vld [vmem:[#allocation10 + $0xe8] sm:$0xff]  }
  0x85   :  { %1790 = vmatpush3.bf16.msra.mxu0 %v1909_v6  ;;  %v1918_v15 = vld [vmem:[#allocation10 + $0x98] sm:$0xff]   ;;  %v1922_v19 = vld [vmem:[#allocation10 + $0xa0] sm:$0xff]   ;;  %v1925_v22 = vld [vmem:[#allocation10 + $0x28] sm:$0xff]  }
  0x86   :  { %1812 = vmatpush3.bf16.msra.mxu1 %v1910_v7  ;;  %1791 = vmatprep.subr.bf16.mxu0 %v1911_v8  ;;  %v1926_v23 = vld [vmem:[#allocation10 + $0xa8] sm:$0xff]   ;;  %v1927_v24 = vld [vmem:[#allocation10 + $0x70] sm:$0xff]   ;;  %v1931_v28 = vld [vmem:[#allocation10 + $0x78] sm:$0xff]  }
  0x87   :  { %1813 = vmatprep.subr.bf16.mxu1 %v1912_v9  ;;  %v1928_v25 = vld [vmem:[#allocation10 + $0xf0] sm:$0xff]   ;;  %v1932_v29 = vld [vmem:[#allocation10 + $0xf8] sm:$0xff]   ;;  %v140_v33 = vld [vmem:[#allocation2 + $0x18] sm:$0xff] }
  0x88   :  { %v1929_v26 = vld [vmem:[#allocation10 + $0x30] sm:$0xff]   ;;  %v1933_v30 = vld [vmem:[#allocation10 + $0x38] sm:$0xff]   ;;  %v146_v36 = vpack.c.bf16 %v140_v33, %v140_v33  ;;  %v139_v38 = vld [vmem:[#allocation2 + $0x10] sm:$0xff] }
  0x89   :  { %1792 = vmatpush3.bf16.msra.mxu0 %v1913_v10  ;;  %v1930_v27 = vld [vmem:[#allocation10 + $0xb0] sm:$0xff]   ;;  %v1934_v31 = vld [vmem:[#allocation10 + $0xb8] sm:$0xff]   ;;  %v145_v39 = vpack.c.bf16 %v139_v38, %v139_v38  ;;  %v1935_v40 = vld [vmem:[#allocation10 + $0x140] sm:$0xff]  }
  0x8a   :  { %1814 = vmatpush3.bf16.msra.mxu1 %v1914_v11  ;;  %1793 = vmatprep.subr.bf16.mxu0 %v1915_v12  ;;  %v138_v32 = vld [vmem:[#allocation2 + $0x8] sm:$0xff]  ;;  %v137_v34 = vld [vmem:[#allocation2] sm:$0xff]  ;;  %v1936_v41 = vld [vmem:[#allocation11] ss:$8 sps:$4 sm:$0xff]  }
  0x8b   :  { %1815 = vmatprep.subr.bf16.mxu1 %v1916_v13  ;;  %v144_v35 = vpack.c.bf16 %v138_v32, %v138_v32  ;;  %v143_v37 = vpack.c.bf16 %v137_v34, %v137_v34  ;;  %612 = vmatprep.mubr.bf16.mxu1 %v146_v36  ;;  %v1938_v42 = vld [vmem:[#allocation11 + $0x4] ss:$8 sps:$4 sm:$0xff]   ;;  %v1941_v45 = vld [vmem:[#allocation11 + $0x10] ss:$8 sps:$4 sm:$0xff]   ;;  %v1943_v46 = vld [vmem:[#allocation11 + $0x14] ss:$8 sps:$4 sm:$0xff]  }
  0x8c   :  { %v1939_v43 = vld [vmem:[#allocation10 + $0x100] sm:$0xff]   ;;  %v1940_v44 = vld [vmem:[#allocation10 + $0x148] sm:$0xff]   ;;  %v1945_v48 = vld [vmem:[#allocation10 + $0x150] sm:$0xff]  }
  0x8d   :  { %1794 = vmatpush3.bf16.msra.mxu0 %v1917_v14  ;;  %572 = vmatprep.mubr.bf16.mxu0 %v144_v35  ;;  %v1944_v47 = vld [vmem:[#allocation10 + $0x108] sm:$0xff]   ;;  %v1949_v51 = vld [vmem:[#allocation10 + $0x110] sm:$0xff]   ;;  %v1950_v52 = vld [vmem:[#allocation10 + $0x158] sm:$0xff]  }
  0x8e   :  { %1816 = vmatpush3.bf16.msra.mxu1 %v1918_v15  ;;  %1795 = vmatprep.subr.bf16.mxu0 %v1919_v16  ;;  %v1946_v49 = vld [vmem:[#allocation11 + $0x20] ss:$8 sps:$4 sm:$0xff]   ;;  %v1948_v50 = vld [vmem:[#allocation11 + $0x24] ss:$8 sps:$4 sm:$0xff]   ;;  %v1951_v53 = vld [vmem:[#allocation11 + $0x30] ss:$8 sps:$4 sm:$0xff]  }
  0x8f   :  { %1817 = vmatprep.subr.bf16.mxu1 %v1920_v17  ;;  %v1953_v54 = vld [vmem:[#allocation11 + $0x34] ss:$8 sps:$4 sm:$0xff]   ;;  %v1955_v56 = vld [vmem:[#allocation10 + $0x160] sm:$0xff]   ;;  %v1960_v60 = vld [vmem:[#allocation10 + $0x168] sm:$0xff]  }
  0x90   :  { %v1954_v55 = vld [vmem:[#allocation10 + $0x118] sm:$0xff]   ;;  %v1958_v57 = vld [vmem:[#allocation11 + $0x44] ss:$8 sps:$4 sm:$0xff]   ;;  %v1956_v58 = vld [vmem:[#allocation11 + $0x40] ss:$8 sps:$4 sm:$0xff]  }
  0x91   :  { %1796 = vmatpush3.bf16.msra.mxu0 %v1921_v18  ;;  %v1959_v59 = vld [vmem:[#allocation10 + $0x120] sm:$0xff]   ;;  %v1963_v61 = vld [vmem:[#allocation11 + $0x54] ss:$8 sps:$4 sm:$0xff]   ;;  %v1961_v62 = vld [vmem:[#allocation11 + $0x50] ss:$8 sps:$4 sm:$0xff]  }
  0x92   :  { %1818 = vmatpush3.bf16.msra.mxu1 %v1922_v19  ;;  %1797 = vmatprep.subr.bf16.mxu0 %v1923_v20  ;;  %v1964_v63 = vld [vmem:[#allocation10 + $0x128] sm:$0xff]   ;;  %v1965_v0 = vld [vmem:[#allocation10 + $0x170] sm:$0xff]   ;;  %v1970_v4 = vld [vmem:[#allocation10 + $0x178] sm:$0xff]  }
  0x93   :  { %1819 = vmatprep.subr.bf16.mxu1 %v1924_v21  ;;  %v1968_v1 = vld [vmem:[#allocation11 + $0x64] ss:$8 sps:$4 sm:$0xff]   ;;  %v1966_v2 = vld [vmem:[#allocation11 + $0x60] ss:$8 sps:$4 sm:$0xff]   ;;  %v1969_v3 = vld [vmem:[#allocation10 + $0x130] sm:$0xff]  }
  0x94   :  { %v1973_v5 = vld [vmem:[#allocation11 + $0x74] ss:$8 sps:$4 sm:$0xff]   ;;  %v1971_v6 = vld [vmem:[#allocation11 + $0x70] ss:$8 sps:$4 sm:$0xff]   ;;  %v1977_v11 = vld [vmem:[#allocation11 + $0x84] ss:$8 sps:$4 sm:$0xff]  }
  0x95   :  { %1798 = vmatpush3.bf16.msra.mxu0 %v1925_v22  ;;  %v142_v7 = vld [vmem:[#allocation2 + $0x28] sm:$0xff]  ;;  %v141_v10 = vld [vmem:[#allocation2 + $0x20] sm:$0xff]  ;;  %v1980_v12 = vld [vmem:[#allocation11 + $0x104] ss:$8 sps:$4 sm:$0xff]  }
  0x96   :  { %1820 = vmatpush3.bf16.msra.mxu1 %v1926_v23  ;;  %1799 = vmatprep.subr.bf16.mxu0 %v1927_v24  ;;  %v1974_v8 = vld [vmem:[#allocation10 + $0x138] sm:$0xff]   ;;  %v148_v9 = vpack.c.bf16 %v142_v7, %v142_v7  ;;  %v147_v13 = vpack.c.bf16 %v141_v10, %v141_v10  ;;  %v1975_v14 = vld [vmem:[#allocation11 + $0x80] ss:$8 sps:$4 sm:$0xff]   ;;  %v1989_v20 = vld [vmem:[#allocation11 + $0xa4] ss:$8 sps:$4 sm:$0xff]  }
  0x97   :  { %1821 = vmatprep.subr.bf16.mxu1 %v1928_v25  ;;  %v1978_v15 = vld [vmem:[#allocation11 + $0x100] ss:$8 sps:$4 sm:$0xff]   ;;  %v1983_v16 = vld [vmem:[#allocation11 + $0x94] ss:$8 sps:$4 sm:$0xff]   ;;  %v1981_v18 = vld [vmem:[#allocation11 + $0x90] ss:$8 sps:$4 sm:$0xff]  }
  0x98   :  { %v1986_v17 = vld [vmem:[#allocation11 + $0x114] ss:$8 sps:$4 sm:$0xff]   ;;  %v1984_v19 = vld [vmem:[#allocation11 + $0x110] ss:$8 sps:$4 sm:$0xff]   ;;  %v1992_v21 = vld [vmem:[#allocation11 + $0x124] ss:$8 sps:$4 sm:$0xff]  }
  0x99   :  { %1800 = vmatpush3.bf16.msra.mxu0 %v1929_v26  ;;  %v1987_v22 = vld [vmem:[#allocation11 + $0xa0] ss:$8 sps:$4 sm:$0xff]   ;;  %v1995_v24 = vld [vmem:[#allocation11 + $0xb4] ss:$8 sps:$4 sm:$0xff]   ;;  %v1993_v26 = vld [vmem:[#allocation11 + $0xb0] ss:$8 sps:$4 sm:$0xff]  }
  0x9a   :  { %1822 = vmatpush3.bf16.msra.mxu1 %v1930_v27  ;;  %1801 = vmatprep.subr.bf16.mxu0 %v1931_v28  ;;  %v1990_v23 = vld [vmem:[#allocation11 + $0x120] ss:$8 sps:$4 sm:$0xff]   ;;  %v1998_v25 = vld [vmem:[#allocation11 + $0x134] ss:$8 sps:$4 sm:$0xff]   ;;  %v1996_v27 = vld [vmem:[#allocation11 + $0x130] ss:$8 sps:$4 sm:$0xff]  }
  0x9b   :  { %1823 = vmatprep.subr.bf16.mxu1 %v1932_v29  ;;  %v2001_v28 = vld [vmem:[#allocation11 + $0xc4] ss:$8 sps:$4 sm:$0xff]   ;;  %v2007_v33 = vld [vmem:[#allocation11 + $0xd4] ss:$8 sps:$4 sm:$0xff]   ;;  %v2005_v36 = vld [vmem:[#allocation11 + $0xd0] ss:$8 sps:$4 sm:$0xff]  }
  0x9c   :  { %v2004_v29 = vld [vmem:[#allocation11 + $0x144] ss:$8 sps:$4 sm:$0xff]   ;;  %v2010_v34 = vld [vmem:[#allocation11 + $0x154] ss:$8 sps:$4 sm:$0xff]  }
  0x9d   :  { %1802 = vmatpush3.bf16.msra.mxu0 %v1933_v30  ;;  %v1999_v30 = vld [vmem:[#allocation11 + $0xc0] ss:$8 sps:$4 sm:$0xff]   ;;  %v2013_v38 = vld [vmem:[#allocation11 + $0xe4] ss:$8 sps:$4 sm:$0xff]   ;;  %v2058_v7 = vld [vmem:[#allocation11 + $0x254] ss:$8 sps:$4 sm:$0xff]  }
  0x9e   :  { %1824 = vmatpush3.bf16.msra.mxu1 %v1934_v31  ;;  %1831 = vmatprep.subr.bf16.mxu0 %v1935_v40  ;;  %v2002_v31 = vld [vmem:[#allocation11 + $0x140] ss:$8 sps:$4 sm:$0xff]   ;;  %v2061_v10 = vld [vmem:[#allocation11 + $0x1e4] ss:$8 sps:$4 sm:$0xff]  }
  0x9f   :  { %1249 = vmatprep.subr.bf16.mxu1 %v1938_v42  ;;  %v662_v32 = vld [vmem:[#allocation5 + $0x8] sm:$0xff]  ;;  %v2019_v42 = vld [vmem:[#allocation11 + $0xf4] ss:$8 sps:$4 sm:$0xff]  }
  0xa0   :  { %573 = vmatmul.mubr.bf16.vlgmr.msra.gmra.mrb[0].mxu0 %v143_v37  ;;  %v668_v35 = vpack.c.bf16 %v662_v32, %v662_v32  ;;  %v2008_v37 = vld [vmem:[#allocation11 + $0x150] ss:$8 sps:$4 sm:$0xff]   ;;  %v2011_v40 = vld [vmem:[#allocation11 + $0xe0] ss:$8 sps:$4 sm:$0xff]  }
  0xa1   :  { %613 = vmatmul.mubr.bf16.vlgmr.msra.gmra.mrb[0].mxu1 %v145_v39  ;;  %1832 = vmatpush3.bf16.msra.mxu0 %v1939_v43  ;;  %v2016_v39 = vld [vmem:[#allocation11 + $0x164] ss:$8 sps:$4 sm:$0xff]   ;;  %v2022_v43 = vld [vmem:[#allocation11 + $0x174] ss:$8 sps:$4 sm:$0xff]  }
  0xa2   :  { %1250 = vmatpush1.bf16.msra.mxu1 %v1936_v41  ;;  %1833 = vmatprep.subr.bf16.mxu0 %v1940_v44  ;;  %v2014_v41 = vld [vmem:[#allocation11 + $0x160] ss:$8 sps:$4 sm:$0xff]   ;;  %v2017_v44 = vld [vmem:[#allocation11 + $0xf0] ss:$8 sps:$4 sm:$0xff]  }
  0xa3   :  { %1251 = vmatprep.subr.bf16.mxu1 %v1943_v46  ;;  %652 = vmatprep.mubr.bf16.mxu0 %v148_v9  ;;  %v661_v46 = vld [vmem:[#allocation5] sm:$0xff]  ;;  %v2056_v9 = vld [vmem:[#allocation11 + $0x250] ss:$8 sps:$4 sm:$0xff]  }
  0xa4   :  { %1281 = vmatprep.mubr.bf16.mxu1 %v668_v35  ;;  %v1372_v32 = vld [vmem:[#allocation7] sm:$0xff] }
  0xa5   :  { %1834 = vmatpush3.bf16.msra.mxu0 %v1944_v47  ;;  %v2025_v47 = vld [vmem:[#allocation11 + $0x184] ss:$8 sps:$4 sm:$0xff]   ;;  %v1373_v35 = vpack.c.bf16 %v1372_v32, %v1372_v32 }
  0xa6   :  { %1252 = vmatpush1.bf16.msra.mxu1 %v1941_v45  ;;  %1835 = vmatprep.subr.bf16.mxu0 %v1945_v48  ;;  %v2020_v45 = vld [vmem:[#allocation11 + $0x170] ss:$8 sps:$4 sm:$0xff]   ;;  %v2028_v48 = vld [vmem:[#allocation11 + $0x204] ss:$8 sps:$4 sm:$0xff]  }
  0xa7   :  { %1253 = vmatprep.subr.bf16.mxu1 %v1948_v50  ;;  %v2023_v50 = vld [vmem:[#allocation11 + $0x180] ss:$8 sps:$4 sm:$0xff]  }
  0xa9   :  { %1836 = vmatpush3.bf16.msra.mxu0 %v1949_v51  ;;  %v2026_v51 = vld [vmem:[#allocation11 + $0x200] ss:$8 sps:$4 sm:$0xff]  }
  0xaa   :  { %1254 = vmatpush1.bf16.msra.mxu1 %v1946_v49  ;;  %1837 = vmatprep.subr.bf16.mxu0 %v1950_v52  ;;  %v667_v49 = vpack.c.bf16 %v661_v46, %v661_v46  ;;  %v2031_v52 = vld [vmem:[#allocation11 + $0x194] ss:$8 sps:$4 sm:$0xff]   ;;  %v2096_v46 = vld [vmem:[#allocation11 + $0x2e4] ss:$8 sps:$4 sm:$0xff]  }
  0xab   :  { %1255 = vmatprep.subr.bf16.mxu1 %v1953_v54  ;;  %v2029_v54 = vld [vmem:[#allocation11 + $0x190] ss:$8 sps:$4 sm:$0xff]  }
  0xad   :  { %1838 = vmatpush3.bf16.msra.mxu0 %v1954_v55  ;;  %v2032_v55 = vld [vmem:[#allocation11 + $0x210] ss:$8 sps:$4 sm:$0xff]  }
  0xae   :  { %1256 = vmatpush1.bf16.msra.mxu1 %v1951_v53  ;;  %1839 = vmatprep.subr.bf16.mxu0 %v1955_v56  ;;  %v2034_v53 = vld [vmem:[#allocation11 + $0x214] ss:$8 sps:$4 sm:$0xff]   ;;  %v2037_v56 = vld [vmem:[#allocation11 + $0x1a4] ss:$8 sps:$4 sm:$0xff]  }
  0xaf   :  { %1257 = vmatprep.subr.bf16.mxu1 %v1958_v57  ;;  %v2040_v57 = vld [vmem:[#allocation11 + $0x224] ss:$8 sps:$4 sm:$0xff]  }
  0xb1   :  { %1840 = vmatpush3.bf16.msra.mxu0 %v1959_v59  ;;  %v2035_v59 = vld [vmem:[#allocation11 + $0x1a0] ss:$8 sps:$4 sm:$0xff]  }
  0xb2   :  { %1258 = vmatpush1.bf16.msra.mxu1 %v1956_v58  ;;  %1841 = vmatprep.subr.bf16.mxu0 %v1960_v60  ;;  %v664_v58 = vld [vmem:[#allocation5 + $0x18] sm:$0xff]  ;;  %v2038_v60 = vld [vmem:[#allocation11 + $0x220] ss:$8 sps:$4 sm:$0xff]  }
  0xb3   :  { %1259 = vmatprep.subr.bf16.mxu1 %v1963_v61  ;;  %v670_v61 = vpack.c.bf16 %v664_v58, %v664_v58 }
  0xb5   :  { %1842 = vmatpush3.bf16.msra.mxu0 %v1964_v63  ;;  %v2046_v63 = vld [vmem:[#allocation11 + $0x234] ss:$8 sps:$4 sm:$0xff]  }
  0xb6   :  { %1260 = vmatpush1.bf16.msra.mxu1 %v1961_v62  ;;  %1843 = vmatprep.subr.bf16.mxu0 %v1965_v0  ;;  %v2043_v62 = vld [vmem:[#allocation11 + $0x1b4] ss:$8 sps:$4 sm:$0xff]   ;;  %v2041_v0 = vld [vmem:[#allocation11 + $0x1b0] ss:$8 sps:$4 sm:$0xff]  }
  0xb7   :  { %1261 = vmatprep.subr.bf16.mxu1 %v1968_v1  ;;  %v2044_v1 = vld [vmem:[#allocation11 + $0x230] ss:$8 sps:$4 sm:$0xff]  }
  0xb9   :  { %1844 = vmatpush3.bf16.msra.mxu0 %v1969_v3  ;;  %v2052_v3 = vld [vmem:[#allocation11 + $0x244] ss:$8 sps:$4 sm:$0xff]  }
  0xba   :  { %1262 = vmatpush1.bf16.msra.mxu1 %v1966_v2  ;;  %1845 = vmatprep.subr.bf16.mxu0 %v1970_v4  ;;  %v2049_v2 = vld [vmem:[#allocation11 + $0x1c4] ss:$8 sps:$4 sm:$0xff]   ;;  %v2047_v4 = vld [vmem:[#allocation11 + $0x1c0] ss:$8 sps:$4 sm:$0xff]  }
  0xbb   :  { %1263 = vmatprep.subr.bf16.mxu1 %v1973_v5  ;;  %v2050_v5 = vld [vmem:[#allocation11 + $0x240] ss:$8 sps:$4 sm:$0xff]  }
  0xbd   :  { %1846 = vmatpush3.bf16.msra.mxu0 %v1974_v8  ;;  %v2053_v8 = vld [vmem:[#allocation11 + $0x1d0] ss:$8 sps:$4 sm:$0xff]  }
  0xbe   :  { %1264 = vmatpush1.bf16.msra.mxu1 %v1971_v6  ;;  %1290 = vmatprep.subr.bf16.mxu0 %v1980_v12  ;;  %v2055_v6 = vld [vmem:[#allocation11 + $0x1d4] ss:$8 sps:$4 sm:$0xff]   ;;  %v666_v12 = vld [vmem:[#allocation5 + $0x28] sm:$0xff] }
  0xbf   :  { %1265 = vmatprep.subr.bf16.mxu1 %v1977_v11  ;;  %v2064_v11 = vld [vmem:[#allocation11 + $0x264] ss:$8 sps:$4 sm:$0xff]  }
  0xc0   :  { %653 = vmatmul.mubr.bf16.vlgmr.msra.gmra.mrb[4].mxu0 %v147_v13  ;;  %v2059_v13 = vld [vmem:[#allocation11 + $0x1e0] ss:$8 sps:$4 sm:$0xff]  }
  0xc1   :  { %1291 = vmatpush1.bf16.msra.mxu0 %v1978_v15  ;;  %1322 = vmatprep.mubr.bf16.mxu0 %v670_v61  ;;  %v672_v15 = vpack.c.bf16 %v666_v12, %v666_v12 }
  0xc2   :  { %1266 = vmatpush1.bf16.msra.mxu1 %v1975_v14  ;;  %1292 = vmatprep.subr.bf16.mxu0 %v1986_v17  ;;  %v2062_v14 = vld [vmem:[#allocation11 + $0x260] ss:$8 sps:$4 sm:$0xff]   ;;  %v2070_v17 = vld [vmem:[#allocation11 + $0x274] ss:$8 sps:$4 sm:$0xff]  }
  0xc3   :  { %1267 = vmatprep.subr.bf16.mxu1 %v1983_v16  ;;  %v2067_v16 = vld [vmem:[#allocation11 + $0x1f4] ss:$8 sps:$4 sm:$0xff]  }
  0xc5   :  { %1293 = vmatpush1.bf16.msra.mxu0 %v1984_v19  ;;  %v2068_v19 = vld [vmem:[#allocation11 + $0x270] ss:$8 sps:$4 sm:$0xff]  }
  0xc6   :  { %1268 = vmatpush1.bf16.msra.mxu1 %v1981_v18  ;;  %1294 = vmatprep.subr.bf16.mxu0 %v1992_v21  ;;  %v2065_v18 = vld [vmem:[#allocation11 + $0x1f0] ss:$8 sps:$4 sm:$0xff]   ;;  %v2073_v21 = vld [vmem:[#allocation11 + $0x284] ss:$8 sps:$4 sm:$0xff]  }
  0xc7   :  { %1269 = vmatprep.subr.bf16.mxu1 %v1989_v20  ;;  %v663_v20 = vld [vmem:[#allocation5 + $0x10] sm:$0xff] }
  0xc9   :  { %1295 = vmatpush1.bf16.msra.mxu0 %v1990_v23  ;;  %v2071_v23 = vld [vmem:[#allocation11 + $0x280] ss:$8 sps:$4 sm:$0xff]  }
  0xca   :  { %1270 = vmatpush1.bf16.msra.mxu1 %v1987_v22  ;;  %1296 = vmatprep.subr.bf16.mxu0 %v1998_v25  ;;  %v669_v22 = vpack.c.bf16 %v663_v20, %v663_v20  ;;  %v2076_v25 = vld [vmem:[#allocation11 + $0x294] ss:$8 sps:$4 sm:$0xff]  }
  0xcb   :  { %1271 = vmatprep.subr.bf16.mxu1 %v1995_v24  ;;  %v2077_v24 = vld [vmem:[%s2585_s8] sm:$0xff]  }
  0xcd   :  { %1297 = vmatpush1.bf16.msra.mxu0 %v1996_v27  ;;  %v2074_v27 = vld [vmem:[#allocation11 + $0x290] ss:$8 sps:$4 sm:$0xff]  }
  0xce   :  { %1272 = vmatpush1.bf16.msra.mxu1 %v1993_v26  ;;  %1298 = vmatprep.subr.bf16.mxu0 %v2004_v29  ;;  %v2344_v26 = vmov 0.0   ;;  %v2080_v29 = vld [vmem:[#allocation11 + $0x2a4] ss:$8 sps:$4 sm:$0xff]  }
  0xcf   :  { %1273 = vmatprep.subr.bf16.mxu1 %v2001_v28  ;;  %v2081_v28 = vld [vmem:[%s2585_s8 + $0x8] sm:$0xff]  }
  0xd1   :  { %1299 = vmatpush1.bf16.msra.mxu0 %v2002_v31  ;;  %v2078_v31 = vld [vmem:[#allocation11 + $0x2a0] ss:$8 sps:$4 sm:$0xff]  }
  0xd2   :  { %1274 = vmatpush1.bf16.msra.mxu1 %v1999_v30  ;;  %1300 = vmatprep.subr.bf16.mxu0 %v2010_v34  ;;  %v2085_v30 = vld [vmem:[%s2585_s8 + $0x10] ss:$0 sps:$4 sm:$0xff]  }
  0xd3   :  { %1275 = vmatprep.subr.bf16.mxu1 %v2007_v33  ;;  %v2084_v33 = vld [vmem:[#allocation11 + $0x2b4] ss:$8 sps:$4 sm:$0xff]   ;;  %v1400_v34 = vsel %vm1398_vm0, %v2085_v30, 0 }
  0xd5   :  { %1301 = vmatpush1.bf16.msra.mxu0 %v2008_v37  ;;  %v2089_v37 = vld [vmem:[#allocation13] sm:$0xff]  }
  0xd6   :  { %1276 = vmatpush1.bf16.msra.mxu1 %v2005_v36  ;;  %1302 = vmatprep.subr.bf16.mxu0 %v2016_v39  ;;  %v2082_v36 = vld [vmem:[#allocation11 + $0x2b0] ss:$8 sps:$4 sm:$0xff]   ;;  %v2086_v39 = vld [vmem:[#allocation11 + $0x2c0] ss:$8 sps:$4 sm:$0xff]  }
  0xd7   :  { %1277 = vmatprep.subr.bf16.mxu1 %v2013_v38  ;;  %v2088_v38 = vld [vmem:[#allocation11 + $0x2c4] ss:$8 sps:$4 sm:$0xff]  }
  0xd9   :  { %1303 = vmatpush1.bf16.msra.mxu0 %v2014_v41  ;;  %v1443_v41 = vld [vmem:[%s2580_s3] sm:$0xff] }
  0xda   :  { %1278 = vmatpush1.bf16.msra.mxu1 %v2011_v40  ;;  %1304 = vmatprep.subr.bf16.mxu0 %v2022_v43  ;;  %v2093_v40 = vld [vmem:[#allocation13 + $0x8] sm:$0xff]   ;;  %v1444_v43 = vpack.c.bf16 %v1443_v41, %v1443_v41 }
  0xdb   :  { %1279 = vmatprep.subr.bf16.mxu1 %v2019_v42  ;;  %v2092_v42 = vld [vmem:[#allocation11 + $0x2d4] ss:$8 sps:$4 sm:$0xff]  }
  0xdd   :  { %1305 = vmatpush1.bf16.msra.mxu0 %v2020_v45  ;;  %v2097_v45 = vld [vmem:[%s2587_s10] sm:$0xff]  }
  0xde   :  { %1280 = vmatpush1.bf16.msra.mxu1 %v2017_v44  ;;  %1306 = vmatprep.subr.bf16.mxu0 %v2025_v47  ;;  %v2090_v44 = vld [vmem:[#allocation11 + $0x2d0] ss:$8 sps:$4 sm:$0xff]   ;;  %v2094_v47 = vld [vmem:[#allocation11 + $0x2e0] ss:$8 sps:$4 sm:$0xff]  }
  0xdf   :  { %1331 = vmatprep.subr.bf16.mxu1 %v2028_v48  ;;  %v1515_v48 = vld [vmem:[#allocation8] sm:$0xff] }
  0xe1   :  { %1282 = vmatmul.mubr.bf16.vlgmr.msra.gmra.mrb[4].mxu1 %v667_v49  ;;  %1307 = vmatpush1.bf16.msra.mxu0 %v2023_v50  ;;  %v2100_v49 = vld [vmem:[#allocation11 + $0x2f4] ss:$8 sps:$4 sm:$0xff]   ;;  %v1516_v50 = vpack.c.bf16 %v1515_v48, %v1515_v48 }
  0xe2   :  { %1332 = vmatpush1.bf16.msra.mxu1 %v2026_v51  ;;  %1308 = vmatprep.subr.bf16.mxu0 %v2031_v52  ;;  %v2098_v51 = vld [vmem:[#allocation11 + $0x2f0] ss:$8 sps:$4 sm:$0xff]   ;;  %v665_v52 = vld [vmem:[#allocation5 + $0x20] sm:$0xff] }
  0xe3   :  { %1333 = vmatprep.subr.bf16.mxu1 %v2034_v53  ;;  %1363 = vmatprep.mubr.bf16.mxu1 %v672_v15  ;;  %v671_v53 = vpack.c.bf16 %v665_v52, %v665_v52 }
  0xe5   :  { %1309 = vmatpush1.bf16.msra.mxu0 %v2029_v54 }
  0xe6   :  { %1334 = vmatpush1.bf16.msra.mxu1 %v2032_v55  ;;  %1310 = vmatprep.subr.bf16.mxu0 %v2037_v56  ;;  %v1631_v56 = vld [vmem:[%s2583_s6] ss:$0 sm:$0xff]  ;;  %s2255_s6 = scalar_lea.vmem %s1593_s26, 128 }
  0xe7   :  { %1335 = vmatprep.subr.bf16.mxu1 %v2040_v57  ;;  %p2256_p0 = scmp.ne.s32.totalorder %s1593_s26, %s2255_s6  ;;  %p2261_p2 = scmp.lt.s32.totalorder %s2255_s6, %s2255_s6 }
  0xe9   :  { %1311 = vmatpush1.bf16.msra.mxu0 %v2035_v59  ;;  %p2262_p3 = por %p2261_p2, %p2260_p1 }
  0xea   :  { %1336 = vmatpush1.bf16.msra.mxu1 %v2038_v60  ;;  %1312 = vmatprep.subr.bf16.mxu0 %v2043_v62 }
  0xeb   :  { %1337 = vmatprep.subr.bf16.mxu1 %v2046_v63  ;;  %p2263_p4 = pnand %p2262_p3, %p2256_p0 }
  0xed   :  { %1313 = vmatpush1.bf16.msra.mxu0 %v2041_v0 }
  0xee   :  { %1338 = vmatpush1.bf16.msra.mxu1 %v2044_v1  ;;  %1314 = vmatprep.subr.bf16.mxu0 %v2049_v2 }
  0xef   :  { %1339 = vmatprep.subr.bf16.mxu1 %v2052_v3 }
  0xf1   :  { %1315 = vmatpush1.bf16.msra.mxu0 %v2047_v4 }
  0xf2   :  { %1340 = vmatpush1.bf16.msra.mxu1 %v2050_v5  ;;  %1316 = vmatprep.subr.bf16.mxu0 %v2055_v6 }
  0xf3   :  { %1341 = vmatprep.subr.bf16.mxu1 %v2058_v7 }
  0xf5   :  { %1317 = vmatpush1.bf16.msra.mxu0 %v2053_v8 }
  0xf6   :  { %1342 = vmatpush1.bf16.msra.mxu1 %v2056_v9  ;;  %1318 = vmatprep.subr.bf16.mxu0 %v2061_v10 }
  0xf7   :  { %1343 = vmatprep.subr.bf16.mxu1 %v2064_v11 }
  0xf9   :  { %1319 = vmatpush1.bf16.msra.mxu0 %v2059_v13 }
  0xfa   :  { %1344 = vmatpush1.bf16.msra.mxu1 %v2062_v14  ;;  %1320 = vmatprep.subr.bf16.mxu0 %v2067_v16 }
  0xfb   :  { %1345 = vmatprep.subr.bf16.mxu1 %v2070_v17 }
  0xfd   :  { %1321 = vmatpush1.bf16.msra.mxu0 %v2065_v18 }
  0xfe   :  { %1346 = vmatpush1.bf16.msra.mxu1 %v2068_v19  ;;  %1862 = vmatprep.subr.bf16.mxu0 %v2344_v26 }
  0xff   :  { %1347 = vmatprep.subr.bf16.mxu1 %v2073_v21 }
 0x100   :  { %1323 = vmatmul.mubr.bf16.vlgmr.msra.gmra.mrb[8].mxu0 %v669_v22 }
 0x101   :  { %1863 = vmatpush3.bf16.msra.mxu0 %v2077_v24  ;;  %1868 = vmatprep.mubr.msk.bf16.mxu0 %vm2345_vm1, %v2344_v26 }
 0x102   :  { %1348 = vmatpush1.bf16.msra.mxu1 %v2071_v23  ;;  %1864 = vmatprep.subr.bf16.mxu0 %v2344_v26 }
 0x103   :  { %1349 = vmatprep.subr.bf16.mxu1 %v2076_v25 }
 0x105   :  { %1865 = vmatpush3.bf16.msra.mxu0 %v2081_v28 }
 0x106   :  { %1350 = vmatpush1.bf16.msra.mxu1 %v2074_v27  ;;  %1866 = vmatprep.subr.bf16.mxu0 %v2344_v26 }
 0x107   :  { %1351 = vmatprep.subr.bf16.mxu1 %v2080_v29 }
 0x109   :  { %1867 = vmatpush3.bf16.msra.mxu0 %v1400_v34 }
 0x10a   :  { %1352 = vmatpush1.bf16.msra.mxu1 %v2078_v31  ;;  %1872 = vmatprep.subr.bf16.mxu0 %v2344_v26 }
 0x10b   :  { %1353 = vmatprep.subr.bf16.mxu1 %v2084_v33 }
 0x10c   :  { %1869 = vmatmul.mubr.msk.bf16.vlgmr.msra.gmra.mrb[12].mxu0 %vm1394_vm2, %v1373_v35 }
 0x10d   :  { %1873 = vmatpush3.bf16.msra.mxu0 %v2089_v37  ;;  %1876 = vmatprep.mubr.msk.bf16.mxu0 %vm2345_vm1, %v2344_v26 }
 0x10e   :  { %1354 = vmatpush1.bf16.msra.mxu1 %v2082_v36  ;;  %1874 = vmatprep.subr.bf16.mxu0 %v2344_v26 }
 0x10f   :  { %1355 = vmatprep.subr.bf16.mxu1 %v2088_v38 }
 0x111   :  { %1875 = vmatpush3.bf16.msra.mxu0 %v2093_v40 }
 0x112   :  { %1356 = vmatpush1.bf16.msra.mxu1 %v2086_v39  ;;  %1880 = vmatprep.subr.bf16.mxu0 %v2344_v26 }
 0x113   :  { %1357 = vmatprep.subr.bf16.mxu1 %v2092_v42 }
 0x114   :  { %1877 = vmatmul.mubr.msk.bf16.vlgmr.msra.gmra.mrb[16].mxu0 %vm1461_vm3, %v1444_v43 }
 0x115   :  { %1881 = vmatpush3.bf16.msra.mxu0 %v2097_v45  ;;  %1882 = vmatprep.mubr.msk.bf16.mxu0 %vm2345_vm1, %v2344_v26 }
 0x116   :  { %1358 = vmatpush1.bf16.msra.mxu1 %v2090_v44 }
 0x117   :  { %1359 = vmatprep.subr.bf16.mxu1 %v2096_v46 }
 0x11a   :  { %1360 = vmatpush1.bf16.msra.mxu1 %v2094_v47 }
 0x11b   :  { %1361 = vmatprep.subr.bf16.mxu1 %v2100_v49 }
 0x11c   :  { %1883 = vmatmul.mubr.msk.bf16.vlgmr.msra.gmra.mrb[20].mxu0 %vm1525_vm4, %v1516_v50 }
 0x11e   :  { %1362 = vmatpush1.bf16.msra.mxu1 %v2098_v51 }
 0x121   :  { %1364 = vmatmul.mubr.bf16.vlgmr.msra.gmra.mrb[8].mxu1 %v671_v53 }
 0x173   :  { %v1803_v54 = vpop.f32.mrb[0].mxu0 }
 0x174   :  { %v1825_v55 = vpop.f32.mrb[0].mxu1  ;;  %v1804_v57 = vpop.f32.mrb[1].mxu0 }
 0x175   :  { %v1826_v58 = vpop.f32.mrb[1].mxu1  ;;  %v1805_v59 = vadd.f32 %v1804_v57, %v1803_v54  ;;  %v1806_v62 = vpop.f32.mrb[2].mxu0 }
 0x176   :  { %v1827_v60 = vadd.f32 %v1826_v58, %v1825_v55  ;;  %v1828_v61 = vpop.f32.mrb[2].mxu1  ;;  %v1807_v0 = vpop.f32.mrb[3].mxu0 }
 0x177   :  { %v1829_v63 = vpop.f32.mrb[3].mxu1  ;;  %v575_v1 = vadd.f32 %v1805_v59, %v1631_v56 }
 0x179   :  { %v615_v2 = vadd.f32 %v1827_v60, %v575_v1 }
 0x193   :  { %v1847_v3 = vpop.f32.mrb[4].mxu0 }
 0x194   :  { %v1848_v4 = vpop.f32.mrb[5].mxu0 }
 0x195   :  { %v1849_v5 = vadd.f32 %v1848_v4, %v1847_v3  ;;  %v1850_v6 = vpop.f32.mrb[6].mxu0 }
 0x196   :  { %v1851_v7 = vpop.f32.mrb[7].mxu0 }
 0x197   :  { %v655_v8 = vadd.f32 %v1849_v5, %v615_v2 }
 0x199   :  { %660 = vst [vmem:[#allocation14] sm:$0xff] %v655_v8 }
 0x19a   :  { %2266 = shalt.err (!%p2263_p4)
}
 0x19b   :  { %s2267_s30 = scalar_lea.hbm %s2590_s13, 128 }
 0x19c   :  { %p2268_p5 = scmp.ne.s32.totalorder %s2590_s13, %s2267_s30  ;;  %p2271_p6 = scmp.lt.u32.totalorder %s2267_s30, %s2590_s13 }
 0x19e   :  { %p2273_p7 = pnand %p2271_p6, %p2268_p5 }
 0x1a0   :  { %2276 = shalt.err (!%p2273_p7)
}
 0x1a1   :  { %1595 = dma.vmem_to_hbm [thread:$0]  %s1593_s26, 128, %s2590_s13, [#allocation4]   ;;  %v1578_v27 = vlaneseq  ;;  %v1786_v39 = vld [vmem:[%s2589_s12] ss:$0 sm:$0xff]  ;;  %v2348_v44 = vmov 1.0  }
 0x1a2   :  { %v1783_v42 = vld [vmem:[%s2588_s11] ss:$0 sm:$0xff]  ;;  %s2347_s7 = smov [#allocation15]   ;;  %s2349_s23 = smov [#allocation17]  }
 0x1a3   :  { %v1579_v28 = vand.u32 127, %v1578_v27  ;;  %s1602_s28 = sshll.u32 %s2347_s7, 4  ;;  %s1612_s4 = sshll.u32 %s2349_s23, 4  ;;  %s1603_s28 = int_to_ptr.vmem [resolvable:$true] %s1602_s28  ;;  %s1613_s4 = int_to_ptr.vmem [resolvable:$true] %s1612_s4 }
 0x1a4   :  { %s2277_s12 = scalar_lea.vmem %s1603_s28, 128  ;;  %p2282_p9 = scmp.lt.s32.totalorder %s1603_s28, %s1603_s28 }
 0x1a5   :  { %vm1580_vm5 = vcmp.ge.s32.totalorder %v1579_v28, 64  ;;  %vm1581_vm6 = vcmp.lt.s32.totalorder %v1579_v28, 96  ;;  %p2278_p8 = scmp.ne.s32.totalorder %s1603_s28, %s2277_s12  ;;  %p2283_p10 = scmp.lt.s32.totalorder %s2277_s12, %s2277_s12 }
 0x1a6   :  { %vm1582_vm7 = vmand %vm1580_vm5, %vm1581_vm6 }
 0x1a7   :  { %v1583_v45 = vsel %vm1582_vm7, -1.0, %v2348_v44  ;;  %p2284_p11 = por %p2283_p10, %p2282_p9 }
 0x1a9   :  { %p2285_p12 = pnand %p2284_p11, %p2278_p8 }
 0x1b4   :  { %v1283_v9 = vpop.f32.mrb[4].mxu1 }
 0x1b5   :  { %v1285_v10 = vpop.f32.mrb[5].mxu1 }
 0x1b6   :  { %v1287_v11 = vpop.f32.mrb[6].mxu1 }
 0x1b7   :  { %v1288_v12 = vpop.f32.mrb[7].mxu1 }
 0x1d3   :  { %v1324_v13 = vpop.f32.mrb[8].mxu0 }
 0x1d4   :  { %v1325_v14 = vadd.f32 %v1324_v13, %v1283_v9  ;;  %v1326_v15 = vpop.f32.mrb[9].mxu0 }
 0x1d5   :  { %v1327_v16 = vadd.f32 %v1326_v15, %v1285_v10  ;;  %v1328_v17 = vpop.f32.mrb[10].mxu0 }
 0x1d6   :  { %v1329_v18 = vpop.f32.mrb[11].mxu0 }
 0x1df   :  { %v1436_v19 = vpop.f32.mrb[12].mxu0 }
 0x1e0   :  { %v1870_v20 = vpop.f32.mrb[13].mxu0 }
 0x1e1   :  { %v1439_v21 = vpop.f32.mrb[14].mxu0 }
 0x1e2   :  { %v1871_v22 = vpop.f32.mrb[15].mxu0 }
 0x1e7   :  { %v1499_v23 = vpop.f32.mrb[16].mxu0 }
 0x1e8   :  { %v1878_v24 = vpop.f32.mrb[17].mxu0 }
 0x1e9   :  { %v1502_v25 = vpop.f32.mrb[18].mxu0 }
 0x1ea   :  { %v1879_v26 = vpop.f32.mrb[19].mxu0 }
 0x1ef   :  { %v1563_v29 = vpop.f32.mrb[20].mxu0 }
 0x1f0   :  { %v1884_v30 = vpop.f32.mrb[21].mxu0 }
 0x1f1   :  { %v1566_v31 = vpop.f32.mrb[22].mxu0 }
 0x1f2   :  { %v1885_v32 = vpop.f32.mrb[23].mxu0 }
 0x1f4   :  { %v1365_v33 = vpop.f32.mrb[8].mxu1 }
 0x1f5   :  { %v1366_v34 = vadd.f32 %v1365_v33, %v1325_v14  ;;  %v1367_v35 = vpop.f32.mrb[9].mxu1 }
 0x1f6   :  { %v1368_v36 = vadd.f32 %v1367_v35, %v1327_v16  ;;  %v1369_v37 = vpop.f32.mrb[10].mxu1 }
 0x1f7   :  { %v1442_v38 = vadd.f32 %v1436_v19, %v1366_v34  ;;  %v1370_v40 = vpop.f32.mrb[11].mxu1 }
 0x1f8   :  { %v1569_v41 = vadd.f32 %v1563_v29, %v1368_v36 }
 0x1f9   :  { %v1505_v43 = vadd.f32 %v1499_v23, %v1442_v38 }
 0x1fa   :  { %v1577_v46 = vadd.f32 %v1786_v39, %v1569_v41 }
 0x1fb   :  { %v1513_v47 = vadd.f32 %v1783_v42, %v1505_v43 }
 0x1fc   :  { %v1584_v48 = vmul.f32 %v1583_v45, %v1577_v46 }
 0x1fd   :  { %1514 = vst [vmem:[#allocation15] sm:$0xff] %v1513_v47 }
 0x1fe   :  { %2288 = shalt.err (!%p2285_p12)
}
 0x1ff   :  { %s2289_s8 = scalar_lea.hbm %s2591_s14, 128 }
 0x200   :  { %p2290_p13 = scmp.ne.s32.totalorder %s2591_s14, %s2289_s8  ;;  %p2293_p0 = scmp.lt.u32.totalorder %s2289_s8, %s2591_s14 }
 0x202   :  { %p2295_p1 = pnand %p2293_p0, %p2290_p13 }
 0x204   :  { %2298 = shalt.err (!%p2295_p1)
}
 0x205   :  { %1605 = dma.vmem_to_hbm [thread:$0]  %s1603_s28, 128, %s2591_s14, [#allocation16]   ;;  %1585 = vst [vmem:[#allocation17] sm:$0xff] %v1584_v48 }
 0x206   :  { %s2299_s26 = scalar_lea.vmem %s1613_s4, 128  ;;  %p2304_p3 = scmp.lt.s32.totalorder %s1613_s4, %s1613_s4 }
 0x207   :  { %p2300_p2 = scmp.ne.s32.totalorder %s1613_s4, %s2299_s26  ;;  %p2305_p4 = scmp.lt.s32.totalorder %s2299_s26, %s2299_s26 }
 0x209   :  { %p2306_p5 = por %p2305_p4, %p2304_p3 }
 0x20b   :  { %p2307_p6 = pnand %p2306_p5, %p2300_p2 }
 0x20d   :  { %2310 = shalt.err (!%p2307_p6)
}
 0x20e   :  { %s2311_s29 = scalar_lea.hbm %s2592_s15, 128 }
 0x20f   :  { %p2312_p7 = scmp.ne.s32.totalorder %s2592_s15, %s2311_s29  ;;  %p2315_p8 = scmp.lt.u32.totalorder %s2311_s29, %s2592_s15 }
 0x211   :  { %p2317_p9 = pnand %p2315_p8, %p2312_p7 }
 0x213   :  { %2320 = shalt.err (!%p2317_p9)
}
 0x214   :  { %1615 = dma.vmem_to_hbm [thread:$0]  %s1613_s4, 128, %s2592_s15, [#allocation16]  }
 0x215   :  { %2329 = dma.done.wait [#allocation4], 128  }
 0x216   :  { %2330 = vsyncadd [#allocation4], 4294967168 }
 0x217   :  { %2331 = dma.done.wait [#allocation16], 256  }
 0x218   :  { %2332 = vsyncadd [#allocation16], 4294967040 }
 0x219   :  { %1625 = vsyncpa [#allocation3], 1 }
 0x21a   :  { %1626 = vsyncpa [#allocation6], 1 }
 0x21b   :  { %1627 = vsyncpa [#allocation9], 1 }
 0x21c   :  { %1628 = vsyncpa [#allocation12], 1 }
 0x21d   :  { %1629 = vsyncpa [#allocation4], 1 }
 0x21e   :  { %1630 = vsyncpa [#allocation16], 1 }

</bundles_post_ra>
